<compile_context>
chip_gen: v5e
topology: v5e:2x2
jax: 0.10.0
libtpu: 0.0.40
codegen_flags: <defaults>
</compile_context>

<pallas_src>
import math
from functools import partial

import jax
import jax.numpy as jnp
from jax.experimental import pallas as pl
from jax.experimental.pallas import tpu as pltpu


def _round_up(x: int, m: int) -> int:
    return ((x + m - 1) // m) * m


def _cdiv(a: int, b: int) -> int:
    return (a + b - 1) // b


# ---------------------------------------------------------------------------
# Kernel bodies
# ---------------------------------------------------------------------------
def _relu_gemm_bias_kernel(a_ref, w_ref, b_ref, o_ref):
    """Single-K-block path: ReLU (VPU) -> one MXU dot -> + folded bias -> store."""
    a = jnp.maximum(a_ref[...], 0).astype(a_ref.dtype)
    o_ref[...] = (
        jnp.dot(a, w_ref[...], preferred_element_type=jnp.float32) + b_ref[...]
    ).astype(o_ref.dtype)


def _relu_gemm_bias_acc_kernel(a_ref, w_ref, b_ref, o_ref, acc_ref):
    """Multi-K-block path (Kdim > 512): f32 VMEM accumulator, reduction axis last."""
    @pl.when(pl.program_id(2) == 0)
    def _():
        acc_ref[...] = jnp.zeros_like(acc_ref)

    a = jnp.maximum(a_ref[...], 0).astype(a_ref.dtype)
    acc_ref[...] += jnp.dot(a, w_ref[...], preferred_element_type=jnp.float32)

    @pl.when(pl.program_id(2) == pl.num_programs(2) - 1)
    def _():
        o_ref[...] = (acc_ref[...] + b_ref[...]).astype(o_ref.dtype)


def _relu_gemm_bias_kernel_t(w_ref, a_ref, b_ref, o_ref):
    """Transposed orientation: C_out on sublanes, N*L_out on lanes (lane-dense out)."""
    a = jnp.maximum(a_ref[...], 0).astype(a_ref.dtype)
    o_ref[...] = (
        jnp.dot(w_ref[...], a, preferred_element_type=jnp.float32) + b_ref[...]
    ).astype(o_ref.dtype)


# ---------------------------------------------------------------------------
# Wrapper
# ---------------------------------------------------------------------------
@partial(jax.jit, static_argnames=("stride", "padding", "eps", "compute_dtype"))
def relu_conv_bn(x, weight, gamma, beta, running_mean, running_var, *,
                 stride: int, padding: int, eps: float = 1e-5,
                 compute_dtype=jnp.bfloat16):
    """ReLU -> Conv1d(C_in, C_out, K, stride, padding, bias=False) -> BatchNorm1d (eval).

    x:      (N, C_in, L)
    weight: (C_out, C_in, K)  (PyTorch Conv1d layout)
    gamma/beta/running_mean/running_var: (C_out,)  (pass ones/zeros for affine=False)
    Returns (N, C_out, L_out) with dtype == x.dtype.
    """
    N, C_in, L = x.shape
    C_out, C_in_w, K = weight.shape
    assert C_in == C_in_w
    L_out = (L + 2 * padding - K) // stride + 1

    # ---- BN folding (inference form) --------------------------------------
    scale = gamma / jnp.sqrt(running_var + eps)                 # (C_out,)
    w_folded = weight * scale[:, None, None]                    # (C_out, C_in, K)
    bias = (beta - running_mean * scale).astype(jnp.float32)    # (C_out,)

    # ---- im2col (ReLU is fused into the kernel; relu(0)=0 commutes w/ pad) --
    # Under jit the pad + gather + transpose + reshape + bf16 cast fuse into a
    # minimal number of HBM passes over the activations.
    x_pad = jnp.pad(x, ((0, 0), (0, 0), (padding, padding)))
    tap = jnp.arange(L_out)[:, None] * stride + jnp.arange(K)[None, :]
    patches = x_pad[:, :, tap]                                  # (N, C_in, L_out, K)

    M = N * L_out
    Kdim = C_in * K
    out_dtype = x.dtype
    vmem_limit = 32 * 1024 * 1024   # explicit: v5e scoped default is only 16 MiB

    # =======================================================================
    # Lane-dense transposed orientation for small C_out (< 128):
    #   O^T (C_out_pad8, M) = W'(C_out, Kdim) @ relu(A^T (Kdim, M))
    # C_out pads to 8 sublanes instead of 128 lanes -> far fewer output bytes.
    # =======================================================================
    if C_out < 128 and Kdim <= 512:
        a_t = patches.transpose(1, 3, 0, 2).reshape(Kdim, M).astype(compute_dtype)
        w_t = w_folded.reshape(C_out, Kdim).astype(compute_dtype)   # cols = c_in*K + k

        C_pad = _round_up(C_out, 8)
        tmL = min(2048, _round_up(M, 128))
        # v7x megacore: prefer >= 2 grid steps on the parallel axis when possible.
        if _round_up(M, 128) > 512 and _cdiv(_round_up(M, 128), tmL) < 2:
            tmL = _round_up(_cdiv(M, 2), 128)
        M_pad = _round_up(M, tmL)

        a_p = jnp.pad(a_t, ((0, 0), (0, M_pad - M)))
        w_p = jnp.pad(w_t, ((0, C_pad - C_out), (0, 0)))
        b_p = jnp.pad(bias, (0, C_pad - C_out)).reshape(C_pad, 1)

        out = pl.pallas_call(
            _relu_gemm_bias_kernel_t,
            out_shape=jax.ShapeDtypeStruct((C_pad, M_pad), out_dtype),
            grid_spec=pltpu.PrefetchScalarGridSpec(
                num_scalar_prefetch=0,
                grid=(M_pad // tmL,),
                in_specs=[
                    pl.BlockSpec((C_pad, Kdim), lambda i: (0, 0)),  # W' (VMEM resident)
                    pl.BlockSpec((Kdim, tmL), lambda i: (0, i)),    # activations
                    pl.BlockSpec((C_pad, 1), lambda i: (0, 0)),     # folded bias
                ],
                out_specs=pl.BlockSpec((C_pad, tmL), lambda i: (0, i)),
            ),
            compiler_params=pltpu.CompilerParams(
                dimension_semantics=("parallel",),
                vmem_limit_bytes=vmem_limit,
            ),
        )(w_p, a_p, b_p)

        y = out[:C_out, :M]                                     # (C_out, N*L_out)
        return y.reshape(C_out, N, L_out).transpose(1, 0, 2)    # (N, C_out, L_out)

    # =======================================================================
    # Standard orientation: O (M, C_out) = relu(A (M, Kdim)) @ W' (Kdim, C_out)
    # =======================================================================
    a = patches.transpose(0, 2, 1, 3).reshape(M, Kdim).astype(compute_dtype)
    w_mat = w_folded.transpose(1, 2, 0).reshape(Kdim, C_out).astype(compute_dtype)

    # N tiling: single resident tile when C_out <= 512 so A is streamed once.
    if C_out <= 512:
        tn = _round_up(C_out, 128)
        N_pad = tn
    else:
        tn = 256
        N_pad = _round_up(C_out, tn)

    # K tiling: full-extent block (no zero-pad DMA, no accumulator) when small.
    if Kdim <= 512:
        tk = Kdim
        K_pad = Kdim
    else:
        tk = 512
        K_pad = _round_up(Kdim, tk)

    # M tiling: large tiles (bf16 operands), split for v7x's 2 TensorCores.
    tm = min(2048, _round_up(M, 8))
    if _round_up(M, 8) > 512 and _cdiv(_round_up(M, 8), tm) < 2:
        tm = _round_up(_cdiv(M, 2), 8)
    M_pad = _round_up(M, tm)

    a_p = jnp.pad(a, ((0, M_pad - M), (0, K_pad - Kdim)))
    w_p = jnp.pad(w_mat, ((0, K_pad - Kdim), (0, N_pad - C_out)))
    b_p = jnp.pad(bias, (0, N_pad - C_out)).reshape(1, N_pad)

    gm, gn, gk = M_pad // tm, N_pad // tn, K_pad // tk
    if gk == 1:
        kernel, scratch = _relu_gemm_bias_kernel, []
    else:
        kernel, scratch = _relu_gemm_bias_acc_kernel, [pltpu.VMEM((tm, tn), jnp.float32)]

    out = pl.pallas_call(
        kernel,
        out_shape=jax.ShapeDtypeStruct((M_pad, N_pad), out_dtype),
        grid_spec=pltpu.PrefetchScalarGridSpec(
            num_scalar_prefetch=0,
            grid=(gm, gn, gk),
            in_specs=[
                pl.BlockSpec((tm, tk), lambda i, j, k: (i, k)),   # activations
                pl.BlockSpec((tk, tn), lambda i, j, k: (k, j)),   # folded weights
                pl.BlockSpec((1, tn), lambda i, j, k: (0, j)),    # folded bias
            ],
            out_specs=pl.BlockSpec((tm, tn), lambda i, j, k: (i, j)),
            scratch_shapes=scratch,
        ),
        compiler_params=pltpu.CompilerParams(
            dimension_semantics=("parallel", "parallel", "arbitrary"),
            vmem_limit_bytes=vmem_limit,
        ),
    )(a_p, w_p, b_p)

    y = out[:M, :C_out]                                         # (N*L_out, C_out)
    return y.reshape(N, L_out, C_out).transpose(0, 2, 1)        # (N, C_out, L_out)


# ---------------------------------------------------------------------------
# Pure-JAX reference: ReLU -> Conv1d -> BatchNorm1d (eval)
# ---------------------------------------------------------------------------
def _reference(x, weight, gamma, beta, mean, var, *, stride, padding, eps=1e-5):
    xr = jnp.maximum(x, 0.0)
    y = jax.lax.conv_general_dilated(
        xr, weight, window_strides=(stride,), padding=[(padding, padding)],
        dimension_numbers=("NCH", "OIH", "NCH"))
    scale = gamma / jnp.sqrt(var + eps)
    return y * scale[None, :, None] + (beta - mean * scale)[None, :, None]


if __name__ == "__main__":
    def run_case(key, N, C_in, C_out, L, K, stride, padding):
        ks = jax.random.split(key, 6)
        x = jax.random.normal(ks[0], (N, C_in, L), dtype=jnp.float32)
        fan_in = C_in * K
        weight = jax.random.normal(ks[1], (C_out, C_in, K),
                                   dtype=jnp.float32) / math.sqrt(fan_in)
        gamma = 1.0 + 0.1 * jax.random.normal(ks[2], (C_out,), dtype=jnp.float32)
        beta = 0.1 * jax.random.normal(ks[3], (C_out,), dtype=jnp.float32)
        mean = 0.1 * jax.random.normal(ks[4], (C_out,), dtype=jnp.float32)
        var = 1.0 + 0.5 * jnp.abs(jax.random.normal(ks[5], (C_out,), dtype=jnp.float32))

        y = relu_conv_bn(x, weight, gamma, beta, mean, var,
                         stride=stride, padding=padding)
        jax.block_until_ready(y)

        y_ref = _reference(x, weight, gamma, beta, mean, var,
                           stride=stride, padding=padding)
        L_out = (L + 2 * padding - K) // stride + 1
        assert y.shape == (N, C_out, L_out), y.shape
        assert y.dtype == x.dtype
        # bf16 GEMM operands (f32 accumulation) -> relaxed tolerance vs f32 reference.
        assert jnp.allclose(y, y_ref, atol=5e-2, rtol=5e-2), \
            float(jnp.max(jnp.abs(y - y_ref)))

    key = jax.random.PRNGKey(0)
    k1, k2 = jax.random.split(key)
    # Small config matching the module (exercises the lane-dense transposed path).
    run_case(k1, N=2, C_in=4, C_out=8, L=16, K=3, stride=1, padding=1)
    # Wider-channel config (exercises the standard orientation + strided conv).
    run_case(k2, N=2, C_in=8, C_out=128, L=16, K=3, stride=2, padding=1)

    print("KERNEL_OK")
</pallas_src>

<mosaic_0001>
module attributes {stable_mosaic.version = 11 : i64} {
  func.func @_relu_gemm_bias_kernel_t(%arg0: i32, %arg1: memref<8x12xbf16, #tpu.memory_space<vmem>>, %arg2: memref<12x128xbf16, #tpu.memory_space<vmem>>, %arg3: memref<8x1xf32, #tpu.memory_space<vmem>>, %arg4: memref<8x128xf32, #tpu.memory_space<vmem>>) attributes {dimension_semantics = [#tpu.dimension_semantics<parallel>], iteration_bounds = array<i64: 1>, scalar_prefetch = 0 : i64, scratch_operands = 0 : i64, tpu.core_type = #tpu.core_type<tc>, window_params = [{pipeline_mode = #tpu.pipeline_mode<synchronous>, transform_indices = @transform_0, window_bounds = array<i64: 8, 12>}, {transform_indices = @transform_1, window_bounds = array<i64: 12, 128>}, {pipeline_mode = #tpu.pipeline_mode<synchronous>, transform_indices = @transform_2, window_bounds = array<i64: 8, 1>}, {transform_indices = @transform_3, window_bounds = array<i64: 8, 128>}]} {
    %c0 = arith.constant 0 : index
    %c0_0 = arith.constant 0 : index
    %0 = vector.load %arg2[%c0, %c0_0] : memref<12x128xbf16, #tpu.memory_space<vmem>>, vector<12x128xbf16>
    %cst = arith.constant 0.000000e+00 : bf16
    %1 = vector.broadcast %cst : bf16 to vector<12x128xbf16>
    %2 = arith.maximumf %0, %1 : vector<12x128xbf16>
    %c0_1 = arith.constant 0 : index
    %c0_2 = arith.constant 0 : index
    %3 = vector.load %arg1[%c0_1, %c0_2] : memref<8x12xbf16, #tpu.memory_space<vmem>>, vector<8x12xbf16>
    %cst_3 = arith.constant dense<0.000000e+00> : vector<8x128xf32>
    %4 = tpu.matmul %3, %2, %cst_3 {dimension_numbers = #tpu.dot_dimension_numbers<[1], [0], [0], [1], [0, 0, 1, 1], [], []>} : vector<8x12xbf16>, vector<12x128xbf16>, vector<8x128xf32> -> vector<8x128xf32>
    %c0_4 = arith.constant 0 : index
    %c0_5 = arith.constant 0 : index
    %5 = vector.load %arg3[%c0_4, %c0_5] : memref<8x1xf32, #tpu.memory_space<vmem>>, vector<8x1xf32>
    %6 = vector.broadcast %5 : vector<8x1xf32> to vector<8x128xf32>
    %7 = arith.addf %4, %6 : vector<8x128xf32>
    %c0_6 = arith.constant 0 : index
    %c0_7 = arith.constant 0 : index
    %8 = vector.load %arg4[%c0_6, %c0_7] : memref<8x128xf32, #tpu.memory_space<vmem>>, vector<8x128xf32>
    tpu.vector_store %arg4[%c0_6, %c0_7], %7 {strides = array<i32>} : memref<8x128xf32, #tpu.memory_space<vmem>>, vector<8x128xf32>,
    return
  }
  func.func @transform_0(%arg0: i32) -> (i32, i32) {
    %c0_i32 = arith.constant 0 : i32
    %c0_i32_0 = arith.constant 0 : i32
    %c0_i32_1 = arith.constant 0 : i32
    return %c0_i32, %c0_i32_0 : i32, i32
  }
  func.func @transform_1(%arg0: i32) -> (i32, i32) {
    %c0_i32 = arith.constant 0 : i32
    %c0_i32_0 = arith.constant 0 : i32
    return %c0_i32, %arg0 : i32, i32
  }
  func.func @transform_2(%arg0: i32) -> (i32, i32) {
    %c0_i32 = arith.constant 0 : i32
    %c0_i32_0 = arith.constant 0 : i32
    %c0_i32_1 = arith.constant 0 : i32
    return %c0_i32, %c0_i32_0 : i32, i32
  }
  func.func @transform_3(%arg0: i32) -> (i32, i32) {
    %c0_i32 = arith.constant 0 : i32
    %c0_i32_0 = arith.constant 0 : i32
    return %c0_i32, %arg0 : i32, i32
  }
}

</mosaic_0001>

<bundles_post_ra>
// kernel: relu_conv_bn.1
= control target key start
LH: loop header
LB: loop body
LE: loop exit
PB: predicated region body
PF: predicated region fallthrough
CT: control target
= control target key end

     0   :  { %v58_v2 = vmov 0   ;;  %vm33_vm0 = vcmask 1045504   ;;  %vm29_vm1 = vcmask 97280   ;;  %s94_s1 = inlined_call_operand.vmem [shape: bf16[12,128], index: 1, kind: input, shape index: {}]   ;;  %s95_s2 = inlined_call_operand.vmem [shape: f32[8,1], index: 2, kind: input, shape index: {}]   ;;  %s96_s0 = inlined_call_operand.vmem [shape: bf16[8,12], index: 0, kind: input, shape index: {}]   ;;  %s97_s3 = inlined_call_operand.vmem [shape: f32[8,128], index: 3, kind: output, shape index: {}]  }
   0x1   :  { %v15_v0 = vld [vmem:[%s94_s1] sm:$0xf]  ;;  %v16_v1 = vld [vmem:[%s94_s1 + $0x4] sm:$0x3]  ;;  %57 = vset.pattern.permute.xlu0 %v58_v2 }
   0x2   :  { %v17_v3 = vunpack.c.l.bf16 %v15_v0  ;;  %v18_v4 = vunpack.c.l.bf16 %v16_v1  ;;  %v23_v5 = vld [vmem:[%s95_s2] sm:$0xff] }
   0x3   :  { %26 = vperm.xlu0 %57, %v23_v5   ;;  %v22_v10 = vld [vmem:[%s96_s0] sm:$0xf] }
   0x4   :  { %v19_v6 = vmax.f32 %v17_v3, 0.0  ;;  %v20_v7 = vmax.f32 %v18_v4, 0.0 }
   0x6   :  { %v21_v8 = vpack.c.bf16 %v20_v7, %v19_v6 }
   0x8   :  { %v35_v9 = vsel %vm33_vm0, %v21_v8, 0 }
   0x9   :  { %44 = vmatpush.bf16.msra.mxu0 %v35_v9 }
   0xc   :  { %55 = vmatmul.msk.bf16.vlgmr.msra.gmra.mxu0 %vm29_vm1, %v22_v10 }
  0x75   :  { %v27_v11 = vpop.permute.xlu0 %26 }
  0x89   :  { %v46_v12 = vpop.f32.mrf.mxu0 }
  0x8a   :  { %v47_v13 = vadd.f32 %v46_v12, %v27_v11 }
  0x8c   :  { %50 = vst [vmem:[%s97_s3] sm:$0xff] %v47_v13 }
  0x91   :  { %v48_v14 = vpop.f32.mrf.mxu0 }

</bundles_post_ra>
